<compile_context>
chip_gen: v6e
topology: v6e:2x2x1
jax: 0.10.0
libtpu: 0.0.40
codegen_flags: <defaults>
</compile_context>

<pallas_src>
import math
import functools

import jax
import jax.numpy as jnp
from jax.experimental import pallas as pl
from jax.experimental.pallas import tpu as pltpu


# ---------------------------------------------------------------- helpers ----
def _layernorm(h, g, b, eps=1e-5):
    mu = jnp.mean(h, axis=-1, keepdims=True)
    var = jnp.mean(jnp.square(h - mu), axis=-1, keepdims=True)
    return (h - mu) * jax.lax.rsqrt(var + eps) * g + b


def _silu(x):
    return x * jax.nn.sigmoid(x)


def _erf_approx(x):
    # Abramowitz & Stegun 7.1.26, |err| < 1.5e-7 — only needs exp/abs/sign,
    # which are guaranteed Mosaic elementwise ops.
    a1, a2, a3, a4, a5 = 0.254829592, -0.284496736, 1.421413741, -1.453152027, 1.061405429
    p = 0.3275911
    ax = jnp.abs(x)
    t = 1.0 / (1.0 + p * ax)
    poly = ((((a5 * t + a4) * t + a3) * t + a2) * t + a1) * t
    return jnp.sign(x) * (1.0 - poly * jnp.exp(-ax * ax))


def _gelu_exact(x):
    # nn.GELU() default = exact erf-based GELU.
    return 0.5 * x * (1.0 + _erf_approx(x * (1.0 / math.sqrt(2.0))))


# ---------------------------------------------------- input projection kernel
def _proj_kernel(x_ref, w_ref, b_ref, pos_ref, o_ref):
    # (rows, Din) @ (Din, D) + bias + positional embedding
    o_ref[...] = (jnp.dot(x_ref[...].astype(w_ref.dtype), w_ref[...],
                          preferred_element_type=jnp.float32)
                  + b_ref[...] + pos_ref[...]).astype(o_ref.dtype)


def _input_proj(x2d, w_in_t, b_in, pos2d, *, rows):
    rt, din = x2d.shape
    d = w_in_t.shape[1]
    return pl.pallas_call(
        _proj_kernel,
        out_shape=jax.ShapeDtypeStruct((rt, d), jnp.float32),
        grid=(rt // rows,),
        in_specs=[pl.BlockSpec((rows, din), lambda i: (i, 0)),
                  pl.BlockSpec(w_in_t.shape, lambda i: (0, 0)),
                  pl.BlockSpec(b_in.shape, lambda i: (0, 0)),
                  pl.BlockSpec((rows, d), lambda i: (i, 0))],
        out_specs=pl.BlockSpec((rows, d), lambda i: (i, 0)),
        compiler_params=pltpu.CompilerParams(dimension_semantics=("parallel",)),
    )(x2d, w_in_t, b_in, pos2d)


# ---------------------------------------------------- transformer block kernel
def _block_kernel(bblk, seq_len, num_head,
                  x_ref, scale_ref, shift_ref,
                  g_attn_ref, b_attn_ref, wq_ref, wk_ref, wv_ref,
                  g1_ref, bt1_ref,
                  w1_ref, bf1_ref, w2_ref, bf2_ref,
                  gs_ref, bs_ref, wo_ref, bo_ref,
                  g2_ref, bt2_ref,
                  o_ref):
    x = x_ref[...]                                   # (R, D), R = bblk * seq_len
    rows, d = x.shape
    hd = d // num_head
    dot_dt = wq_ref.dtype                            # f32 or bf16 (MXU operands)

    # ---- TemporalSelfAttention -------------------------------------------
    xn = _layernorm(x, g_attn_ref[...], b_attn_ref[...])
    xnc = xn.astype(dot_dt)
    q = jnp.dot(xnc, wq_ref[...], preferred_element_type=jnp.float32)
    k = jnp.dot(xnc, wk_ref[...], preferred_element_type=jnp.float32)
    v = jnp.dot(xnc, wv_ref[...], preferred_element_type=jnp.float32)

    # View the row block as (bblk, T, D); attention is batched over the bblk
    # sequences with one 3-D dot_general per head (no VMEM scratch, results
    # stay in registers).  Leading-dim reshapes keep the lane dim intact.
    q3 = q.reshape(bblk, seq_len, d)
    k3 = k.reshape(bblk, seq_len, d)
    v3 = v.reshape(bblk, seq_len, d)
    inv_sqrt_hd = 1.0 / math.sqrt(hd)

    head_outs = []
    for h in range(num_head):                        # static, small unroll
        sl = slice(h * hd, (h + 1) * hd)
        qh = q3[:, :, sl].astype(dot_dt)             # (bblk, T, hd)
        kh = k3[:, :, sl].astype(dot_dt)
        vh = v3[:, :, sl].astype(dot_dt)
        s = jax.lax.dot_general(qh, kh, (((2,), (2,)), ((0,), (0,))),
                                preferred_element_type=jnp.float32) * inv_sqrt_hd
        s = s - jnp.max(s, axis=-1, keepdims=True)   # (bblk, T, T), f32 softmax
        p = jnp.exp(s)
        p = p / jnp.sum(p, axis=-1, keepdims=True)
        head_outs.append(
            jax.lax.dot_general(p.astype(dot_dt), vh, (((2,), (1,)), ((0,), (0,))),
                                preferred_element_type=jnp.float32))
    attn = jnp.concatenate(head_outs, axis=-1).reshape(rows, d)

    # ---- residual + norm1 (dropout = identity) -----------------------------
    x1 = _layernorm(x + attn, g1_ref[...], bt1_ref[...])

    # ---- FFN main path ------------------------------------------------------
    h1 = _gelu_exact(jnp.dot(x1.astype(dot_dt), w1_ref[...],
                             preferred_element_type=jnp.float32) + bf1_ref[...])
    y = jnp.dot(h1.astype(dot_dt), w2_ref[...],
                preferred_element_type=jnp.float32) + bf2_ref[...]

    # ---- StylizationBlock (scale/shift precomputed on host) ----------------
    hs = _layernorm(y, gs_ref[...], bs_ref[...]) * (1.0 + scale_ref[...]) + shift_ref[...]
    proj = jnp.dot(_silu(hs).astype(dot_dt), wo_ref[...],
                   preferred_element_type=jnp.float32) + bo_ref[...]

    ffn_out = x1 + proj                              # FFN residual
    x2 = x1 + ffn_out                                # block residual
    o_ref[...] = _layernorm(x2, g2_ref[...], bt2_ref[...]).astype(o_ref.dtype)


def _prep_layer(p, matmul_dtype):
    """Pre-transpose weights to (in, out) layout; 1-D params -> (1, N) rows."""
    def row(v):
        return v.reshape(1, -1).astype(jnp.float32)

    def mm(w):
        return w.T.astype(matmul_dtype)

    return (row(p["g_attn"]), row(p["b_attn"]),
            mm(p["wq"]), mm(p["wk"]), mm(p["wv"]),
            row(p["g1"]), row(p["bt1"]),
            mm(p["w1"]), row(p["bf1"]),
            mm(p["w2"]), row(p["bf2"]),
            row(p["gs"]), row(p["bs"]),
            mm(p["wo"]), row(p["bo"]),
            row(p["g2"]), row(p["bt2"]))


def _block_call(x2d, scale, shift, flat_w, *, bblk, seq_len, num_head):
    rt, d = x2d.shape
    rows = bblk * seq_len

    def fullspec(a):
        nd = a.ndim
        return pl.BlockSpec(a.shape, lambda i, _n=nd: (0,) * _n)

    in_specs = ([pl.BlockSpec((rows, d), lambda i: (i, 0)),
                 fullspec(scale), fullspec(shift)] +
                [fullspec(a) for a in flat_w])

    # NOTE: at production sizes (large D/FFN/T) re-derive `rows` and set
    # vmem_limit_bytes for v7x's 64 MiB VMEM (half of v5e/v6e).
    return pl.pallas_call(
        functools.partial(_block_kernel, bblk, seq_len, num_head),
        out_shape=jax.ShapeDtypeStruct((rt, d), x2d.dtype),
        grid=(rt // rows,),
        in_specs=in_specs,
        out_specs=pl.BlockSpec((rows, d), lambda i: (i, 0)),
        compiler_params=pltpu.CompilerParams(dimension_semantics=("parallel",)),
    )(x2d, scale, shift, *flat_w)


# ---------------------------------------------------------------- encoder ----
def advanced_transformer_encoder(x, params, num_head, matmul_dtype=jnp.float32):
    """Mirrors AdvancedTransformerEncoder.forward (eval mode). Returns (x, time_cond)."""
    b, t, din = x.shape
    d = params["w_in"].shape[0]

    # batch-block: largest divisor of B keeping bblk*T rows <= 512 (amortizes
    # per-grid-step overhead; with the toy shapes this folds the whole batch).
    bblk = 1
    for cand in range(1, b + 1):
        if b % cand == 0 and cand * t <= 512:
            bblk = cand
    rows = bblk * t

    # ---- input_proj + positional embedding (Pallas kernel) -----------------
    x2d = x.reshape(b * t, din)
    pos = params["pos"][:, :t, :]                                   # (1, T, D)
    pos2d = jnp.broadcast_to(pos, (b, t, d)).reshape(b * t, d)
    w_in_t = params["w_in"].T.astype(matmul_dtype)                  # (Din, D)
    b_in = params["b_in"].reshape(1, d).astype(jnp.float32)
    h2d = _input_proj(x2d, w_in_t, b_in, pos2d, rows=rows)

    # time conditioning: tiny (T, D) reduction — plain JAX (hoisted).
    time_cond = jnp.mean(pos, axis=1)                               # (1, D)
    silu_emb = jax.nn.silu(time_cond)

    # ---- transformer blocks -------------------------------------------------
    for lp in params["layers"]:
        # StylizationBlock emb projection hoisted out of the kernel (1-row op).
        eo = silu_emb @ lp["we"].T + lp["be"]                       # (1, 2D)
        scale, shift = eo[:, :d], eo[:, d:]
        flat = _prep_layer(lp, matmul_dtype)
        h2d = _block_call(h2d, scale, shift, flat,
                          bblk=bblk, seq_len=t, num_head=num_head)

    return h2d.reshape(b, t, d), time_cond


# ---------------------------------------------------------- params / ref -----
def _init_layer(key, d, f, e):
    ks = iter(jax.random.split(key, 32))

    def w(shape, scale=0.05):
        return scale * jax.random.normal(next(ks), shape, jnp.float32)

    def ln_g():
        return 1.0 + 0.1 * jax.random.normal(next(ks), (d,), jnp.float32)

    def ln_b():
        return 0.1 * jax.random.normal(next(ks), (d,), jnp.float32)

    # NOTE: zero_module()-initialised linears (ffn.linear2, stylization out
    # linear) get small random weights so the check exercises the full path.
    return dict(
        g_attn=ln_g(), b_attn=ln_b(),
        wq=w((d, d)), wk=w((d, d)), wv=w((d, d)),
        g1=ln_g(), bt1=ln_b(),
        w1=w((f, d)), bf1=w((f,)),
        w2=w((d, f)), bf2=w((d,)),
        we=w((2 * d, e)), be=w((2 * d,)),
        gs=ln_g(), bs=ln_b(),
        wo=w((d, d)), bo=w((d,)),
        g2=ln_g(), bt2=ln_b(),
    )


def init_params(key, input_dim, latent_dim, ffn_dim, num_layers, max_len=1000):
    d = latent_dim
    k_in, k_b, k_pos, k_layers = jax.random.split(key, 4)
    layer_keys = jax.random.split(k_layers, num_layers)
    return dict(
        w_in=0.05 * jax.random.normal(k_in, (d, input_dim), jnp.float32),
        b_in=0.05 * jax.random.normal(k_b, (d,), jnp.float32),
        pos=0.1 * jax.random.normal(k_pos, (1, max_len, d), jnp.float32),
        layers=[_init_layer(k, d, ffn_dim, d) for k in layer_keys],  # time_embed_dim = latent_dim
    )


def _reference_block(x, emb, p, num_head):
    def ln(h, g, b):
        mu = h.mean(-1, keepdims=True)
        var = jnp.square(h - mu).mean(-1, keepdims=True)
        return (h - mu) / jnp.sqrt(var + 1e-5) * g + b

    bsz, t, d = x.shape
    hnum = num_head
    hd = d // hnum
    xn = ln(x, p["g_attn"], p["b_attn"])
    q = (xn @ p["wq"].T).reshape(bsz, t, hnum, hd).transpose(0, 2, 1, 3)
    k = (xn @ p["wk"].T).reshape(bsz, t, hnum, hd).transpose(0, 2, 1, 3)
    v = (xn @ p["wv"].T).reshape(bsz, t, hnum, hd).transpose(0, 2, 1, 3)
    s = jnp.einsum("bhtd,bhsd->bhts", q, k) / math.sqrt(hd)
    attn = jax.nn.softmax(s, axis=-1)
    attn_out = jnp.einsum("bhts,bhsd->bhtd", attn, v).transpose(0, 2, 1, 3).reshape(bsz, t, d)

    x1 = ln(x + attn_out, p["g1"], p["bt1"])

    z = x1 @ p["w1"].T + p["bf1"]
    h1 = 0.5 * z * (1.0 + jax.lax.erf(z / math.sqrt(2.0)))   # exact GELU
    y = h1 @ p["w2"].T + p["bf2"]

    eo = (jax.nn.silu(emb) @ p["we"].T + p["be"])[:, None, :]
    scale, shift = eo[..., :d], eo[..., d:]
    hs = ln(y, p["gs"], p["bs"]) * (1.0 + scale) + shift
    proj = jax.nn.silu(hs) @ p["wo"].T + p["bo"]

    ffn_out = x1 + proj
    return ln(x1 + ffn_out, p["g2"], p["bt2"])


def reference_encoder(x, params, num_head):
    """Pure-JAX mirror of AdvancedTransformerEncoder.forward (eval mode)."""
    bsz, t, _ = x.shape
    h = x @ params["w_in"].T + params["b_in"]
    pos = params["pos"][:, :t, :]
    h = h + pos
    time_cond = pos.mean(axis=1)
    for lp in params["layers"]:
        h = _reference_block(h, time_cond, lp, num_head)
    return h, time_cond


# ------------------------------------------------------------------- main ----
if __name__ == "__main__":
    B, T = 2, 8
    INPUT_DIM, LATENT_DIM, FFN_DIM = 16, 32, 64
    NUM_LAYERS, NUM_HEAD = 2, 4

    key = jax.random.PRNGKey(0)
    kx, kp = jax.random.split(key)
    x = jax.random.normal(kx, (B, T, INPUT_DIM), jnp.float32)
    params = init_params(kp, INPUT_DIM, LATENT_DIM, FFN_DIM, NUM_LAYERS)

    ref_out, ref_tc = reference_encoder(x, params, NUM_HEAD)

    # f32 matmul operands
    out, tc = advanced_transformer_encoder(x, params, NUM_HEAD)
    out = jax.block_until_ready(out)
    assert out.shape == (B, T, LATENT_DIM) and tc.shape == (1, LATENT_DIM)
    err = float(jnp.max(jnp.abs(out - ref_out)))
    assert err < 1e-2, f"f32 max abs err {err}"
    assert bool(jnp.allclose(tc, ref_tc, atol=1e-5)), "time_cond mismatch"

    # bf16 matmul operands, f32 accumulation (v6e/v7x MXU-native path);
    # looser tolerance accounts for bf16 operand rounding only.
    out_bf16, _ = advanced_transformer_encoder(x, params, NUM_HEAD,
                                               matmul_dtype=jnp.bfloat16)
    out_bf16 = jax.block_until_ready(out_bf16)
    err_bf16 = float(jnp.max(jnp.abs(out_bf16 - ref_out)))
    assert err_bf16 < 2e-1, f"bf16 max abs err {err_bf16}"

    print("KERNEL_OK")
</pallas_src>

<mosaic_0001>
module attributes {stable_mosaic.version = 11 : i64} {
  func.func @_proj_kernel(%arg0: i32, %arg1: memref<16x16xf32, #tpu.memory_space<vmem>>, %arg2: memref<16x32xf32, #tpu.memory_space<vmem>>, %arg3: memref<1x32xf32, #tpu.memory_space<vmem>>, %arg4: memref<16x32xf32, #tpu.memory_space<vmem>>, %arg5: memref<16x32xf32, #tpu.memory_space<vmem>>) attributes {dimension_semantics = [#tpu.dimension_semantics<parallel>], iteration_bounds = array<i64: 1>, scalar_prefetch = 0 : i64, scratch_operands = 0 : i64, tpu.core_type = #tpu.core_type<tc>, window_params = [{transform_indices = @transform_0, window_bounds = array<i64: 16, 16>}, {pipeline_mode = #tpu.pipeline_mode<synchronous>, transform_indices = @transform_1, window_bounds = array<i64: 16, 32>}, {pipeline_mode = #tpu.pipeline_mode<synchronous>, transform_indices = @transform_2, window_bounds = array<i64: 1, 32>}, {transform_indices = @transform_3, window_bounds = array<i64: 16, 32>}, {transform_indices = @transform_4, window_bounds = array<i64: 16, 32>}]} {
    %c0 = arith.constant 0 : index
    %c0_0 = arith.constant 0 : index
    %0 = vector.load %arg1[%c0, %c0_0] : memref<16x16xf32, #tpu.memory_space<vmem>>, vector<16x16xf32>
    %c0_1 = arith.constant 0 : index
    %c0_2 = arith.constant 0 : index
    %1 = vector.load %arg2[%c0_1, %c0_2] : memref<16x32xf32, #tpu.memory_space<vmem>>, vector<16x32xf32>
    %cst = arith.constant dense<0.000000e+00> : vector<16x32xf32>
    %2 = tpu.matmul %0, %1, %cst {dimension_numbers = #tpu.dot_dimension_numbers<[1], [0], [0], [1], [0, 0, 1, 1], [], []>} : vector<16x16xf32>, vector<16x32xf32>, vector<16x32xf32> -> vector<16x32xf32>
    %c0_3 = arith.constant 0 : index
    %c0_4 = arith.constant 0 : index
    %3 = vector.load %arg3[%c0_3, %c0_4] : memref<1x32xf32, #tpu.memory_space<vmem>>, vector<1x32xf32>
    %4 = vector.broadcast %3 : vector<1x32xf32> to vector<16x32xf32>
    %5 = arith.addf %2, %4 : vector<16x32xf32>
    %c0_5 = arith.constant 0 : index
    %c0_6 = arith.constant 0 : index
    %6 = vector.load %arg4[%c0_5, %c0_6] : memref<16x32xf32, #tpu.memory_space<vmem>>, vector<16x32xf32>
    %7 = arith.addf %5, %6 : vector<16x32xf32>
    %c0_7 = arith.constant 0 : index
    %c0_8 = arith.constant 0 : index
    %8 = vector.load %arg5[%c0_7, %c0_8] : memref<16x32xf32, #tpu.memory_space<vmem>>, vector<16x32xf32>
    tpu.vector_store %arg5[%c0_7, %c0_8], %7 {strides = array<i32>} : memref<16x32xf32, #tpu.memory_space<vmem>>, vector<16x32xf32>,
    return
  }
  func.func @transform_0(%arg0: i32) -> (i32, i32) {
    %c0_i32 = arith.constant 0 : i32
    %c0_i32_0 = arith.constant 0 : i32
    return %arg0, %c0_i32 : i32, i32
  }
  func.func @transform_1(%arg0: i32) -> (i32, i32) {
    %c0_i32 = arith.constant 0 : i32
    %c0_i32_0 = arith.constant 0 : i32
    %c0_i32_1 = arith.constant 0 : i32
    return %c0_i32, %c0_i32_0 : i32, i32
  }
  func.func @transform_2(%arg0: i32) -> (i32, i32) {
    %c0_i32 = arith.constant 0 : i32
    %c0_i32_0 = arith.constant 0 : i32
    %c0_i32_1 = arith.constant 0 : i32
    return %c0_i32, %c0_i32_0 : i32, i32
  }
  func.func @transform_3(%arg0: i32) -> (i32, i32) {
    %c0_i32 = arith.constant 0 : i32
    %c0_i32_0 = arith.constant 0 : i32
    return %arg0, %c0_i32 : i32, i32
  }
  func.func @transform_4(%arg0: i32) -> (i32, i32) {
    %c0_i32 = arith.constant 0 : i32
    %c0_i32_0 = arith.constant 0 : i32
    return %arg0, %c0_i32 : i32, i32
  }
}

</mosaic_0001>

<bundles_post_ra>
// kernel: tpu_custom_call.1
= control target key start
LH: loop header
LB: loop body
LE: loop exit
PB: predicated region body
PF: predicated region fallthrough
CT: control target
= control target key end

     0   :  { %9 = vsyncpa [#allocation3], 0  ;;  %s341_s0 = inlined_call_operand.hbm [shape: f32[16,16], index: 0, kind: input, shape index: {}]   ;;  %s342_s1 = inlined_call_operand.hbm [shape: f32[16,32], index: 1, kind: input, shape index: {}]   ;;  %s343_s2 = inlined_call_operand.vmem [shape: f32[1,32], index: 2, kind: input, shape index: {}]   ;;  %s344_s3 = inlined_call_operand.hbm [shape: f32[16,32], index: 3, kind: input, shape index: {}]   ;;  %s345_s4 = inlined_call_operand.hbm [shape: f32[16,32], index: 4, kind: output, shape index: {}]  }
   0x1   :  { %10 = vsyncpa [#allocation6], 0 }
   0x2   :  { %11 = vsyncpa [#allocation4], 0  ;;  %s283_s15 = smov [#allocation5]   ;;  %s284_s17 = smov [#allocation2]  }
   0x3   :  { %s29_s16 = sshll.u32 %s283_s15, 4  ;;  %s17_s18 = sshll.u32 %s284_s17, 4  ;;  %s30_s16 = int_to_ptr.vmem [resolvable:$true] %s29_s16  ;;  %s18_s18 = int_to_ptr.vmem [resolvable:$true] %s17_s18 }
   0x4   :  { %s205_s19 = scalar_lea.vmem %s30_s16, 256  ;;  %p210_p1 = scmp.lt.s32.totalorder %s30_s16, %s30_s16 }
   0x5   :  { %p206_p0 = scmp.ne.s32.totalorder %s30_s16, %s205_s19  ;;  %p211_p2 = scmp.lt.s32.totalorder %s205_s19, %s205_s19 }
   0x7   :  { %p212_p3 = por %p211_p2, %p210_p1 }
   0x9   :  { %p213_p4 = pnand %p212_p3, %p206_p0 }
   0xb   :  { %216 = shalt.err (!%p213_p4)
}
   0xc   :  { %s285_s20 = smov 128   ;;  %s286_s21 = smov 8  }
   0xd   :  { %35 = dma.hbm_to_vmem [thread:$0]  %s342_s1, 256, %s30_s16, [#allocation6], %s285_s20, %s285_s20, %s286_s21  }
   0xe   :  { %s225_s24 = scalar_lea.vmem %s18_s18, 256  ;;  %p230_p6 = scmp.lt.s32.totalorder %s18_s18, %s18_s18 }
   0xf   :  { %p226_p5 = scmp.ne.s32.totalorder %s18_s18, %s225_s24  ;;  %p231_p7 = scmp.lt.s32.totalorder %s225_s24, %s225_s24 }
  0x11   :  { %p232_p8 = por %p231_p7, %p230_p6 }
  0x13   :  { %p233_p9 = pnand %p232_p8, %p226_p5 }
  0x15   :  { %236 = shalt.err (!%p233_p9)
}
  0x16   :  { %23 = dma.hbm_to_vmem [thread:$0]  %s341_s0, 256, %s18_s18, [#allocation3], %s285_s20, %s285_s20, %s286_s21  }
  0x17   :  { %s287_s27 = smov [#allocation7]  }
  0x18   :  { %s43_s28 = sshll.u32 %s287_s27, 4  ;;  %s44_s28 = int_to_ptr.vmem [resolvable:$true] %s43_s28 }
  0x19   :  { %s245_s29 = scalar_lea.vmem %s44_s28, 256  ;;  %p250_p11 = scmp.lt.s32.totalorder %s44_s28, %s44_s28 }
  0x1a   :  { %p246_p10 = scmp.ne.s32.totalorder %s44_s28, %s245_s29  ;;  %p251_p12 = scmp.lt.s32.totalorder %s245_s29, %s245_s29 }
  0x1c   :  { %p252_p13 = por %p251_p12, %p250_p11 }
  0x1e   :  { %p253_p0 = pnand %p252_p13, %p246_p10 }
  0x20   :  { %256 = shalt.err (!%p253_p0)
}
  0x21   :  { %49 = dma.hbm_to_vmem [thread:$0]  %s344_s3, 256, %s44_s28, [#allocation6], %s285_s20, %s285_s20, %s286_s21  }
  0x22   :  { %277 = dma.done.wait [#allocation3], 256  }
  0x23   :  { %278 = vsyncadd [#allocation3], 4294967040 }
  0x24   :  { %279 = dma.done.wait [#allocation6], 512  }
  0x25   :  { %280 = vsyncadd [#allocation6], 4294966784  ;;  %vm70_vm0 = vcmask 130048   ;;  %v62_v0 = vld [vmem:[#allocation5 + $0x8] sm:$0xff]  ;;  %v61_v1 = vld [vmem:[#allocation5] sm:$0xff]  ;;  %vm156_vm1 = vcmask 261120  }
  0x26   :  { %v59_v2 = vld [vmem:[#allocation2] sm:$0xff]  ;;  %184 = vmatprep.subr.mxu0 %v62_v0  ;;  %v60_v3 = vld [vmem:[#allocation2 + $0x8] sm:$0xff]  ;;  %s288_s3 = smov [#allocation8]  }
  0x27   :  { %188 = vmatprep.mubr.msk.f32.mxu0 %vm70_vm0, %v59_v2  ;;  %185 = vmatpush3.msra.mxu0 %v62_v0  ;;  %v177_v4 = vld [vmem:[%s343_s2] ss:$0 sm:$0xff]  ;;  %v153_v6 = vld [vmem:[#allocation7 + $0x8] sm:$0xff]  ;;  %s164_s6 = sshll.u32 %s288_s3, 4  ;;  %s165_s6 = int_to_ptr.vmem [resolvable:$true] %s164_s6 }
  0x28   :  { %186 = vmatprep.subr.mxu0 %v61_v1  ;;  %v152_v9 = vld [vmem:[#allocation7] sm:$0xff]  ;;  %s257_s7 = scalar_lea.vmem %s165_s6, 256  ;;  %p262_p2 = scmp.lt.s32.totalorder %s165_s6, %s165_s6 }
  0x29   :  { %187 = vmatpush3.msra.mxu0 %v61_v1  ;;  %p258_p1 = scmp.ne.s32.totalorder %s165_s6, %s257_s7  ;;  %p263_p3 = scmp.lt.s32.totalorder %s257_s7, %s257_s7 }
  0x2a   :  { %189 = vmatmul.mubr.msk.f32.vlgmr.msra.gmra.mxu0 %vm70_vm0, %v60_v3 }
  0x2b   :  { %p264_p4 = por %p263_p3, %p262_p2 }
  0x2d   :  { %p265_p5 = pnand %p264_p4, %p258_p1 }
  0xea   :  { %v190_v5 = vpop.f32.mrf.mxu0 }
  0xeb   :  { %v149_v7 = vadd.f32 %v190_v5, %v177_v4 }
  0xec   :  { %v143_v8 = vpop.f32.mrf.mxu0 }
  0xed   :  { %v155_v10 = vadd.f32 %v153_v6, %v149_v7  ;;  %v144_v11 = vadd.f32 %v177_v4, %v143_v8 }
  0xef   :  { %v154_v12 = vadd.f32 %v152_v9, %v144_v11  ;;  %158 = vst.msk [vmem:[#allocation8 + $0x8] sm:$0xff] %vm156_vm1, %v155_v10 }
  0xf1   :  { %157 = vst.msk [vmem:[#allocation8] sm:$0xff] %vm156_vm1, %v154_v12 }
  0xf2   :  { %268 = shalt.err (!%p265_p5)
}
  0xf3   :  { %170 = dma.vmem_to_hbm [thread:$0]  %s165_s6, 256, %s345_s4, [#allocation4], %s285_s20, %s285_s20, %s286_s21  }
  0xf4   :  { %281 = dma.done.wait [#allocation4], 256  }
  0xf5   :  { %282 = vsyncadd [#allocation4], 4294967040 }
  0xf6   :  { %174 = vsyncpa [#allocation3], 1 }
  0xf7   :  { %175 = vsyncpa [#allocation6], 1 }
  0xf8   :  { %176 = vsyncpa [#allocation4], 1 }

</bundles_post_ra>
